<compile_context>
chip_gen: v7x
topology: tpu7x:2x2x1
jax: 0.10.0
libtpu: 0.0.40
codegen_flags: <defaults>
</compile_context>

<pallas_src>
import functools

import jax
import jax.numpy as jnp
from jax.experimental import pallas as pl
from jax.experimental.pallas import tpu as pltpu


def _round_up(x, m):
    return ((x + m - 1) // m) * m


def all_decoder_kernel(z_ref, w_ref, b_ref, out_ref):
    # Single fused affine: (tile_b, Z) @ (Z, out_dim) accumulated in f32 on the
    # MXU, bias added in the f32 accumulator (VPU add is free under the
    # store-bound roofline), stored as f32.
    y = jnp.dot(z_ref[...], w_ref[...], preferred_element_type=jnp.float32)
    out_ref[...] = (y + b_ref[...]).astype(out_ref.dtype)


def prepare_fused_params(w1, b1, w2, b2, param_dtype=jnp.bfloat16):
    """Fold the two affine layers into one. Call ONCE at parameter-prep time.

    Valid because AllDecoder.forward has no nonlinearity between mlp1 and mlp3:
      (z @ W1 + b1) @ W2 + b2 == z @ (W1 @ W2) + (b1 @ W2 + b2)
    Weights are cast to `param_dtype` (bf16 by default) to halve DMA traffic;
    the bias stays f32 since it is added in the f32 accumulator.
    """
    w1 = w1.astype(jnp.float32)
    w2 = w2.astype(jnp.float32)
    w_fused = jnp.dot(w1, w2, preferred_element_type=jnp.float32)
    b_fused = jnp.dot(b1.astype(jnp.float32), w2,
                      preferred_element_type=jnp.float32) + b2.astype(jnp.float32)
    return w_fused.astype(param_dtype), b_fused.astype(jnp.float32)


@functools.partial(jax.jit, static_argnames=("num_steps", "wpt_dim", "max_tile_b"))
def all_decoder_forward(z_all, w_fused, b_fused, *, num_steps, wpt_dim,
                        max_tile_b=1024):
    B, Z = z_all.shape
    out_dim = num_steps * wpt_dim
    assert w_fused.shape == (Z, out_dim)
    assert b_fused.shape == (1, out_dim)

    # --- batch tiling ------------------------------------------------------
    # Pad rows only to a multiple of 8 (sublane), never to a full tile.
    b8 = _round_up(B, 8)
    n_tiles = max(1, pl.cdiv(b8, max_tile_b))
    if b8 >= 16 and n_tiles < 2:
        n_tiles = 2                       # v7x: give both TensorCores a tile
    tile_b = _round_up(pl.cdiv(b8, n_tiles), 8)
    b_pad = n_tiles * tile_b              # pad is at most n_tiles*8 - 1 rows

    z = z_all.astype(w_fused.dtype)       # bf16 (or f32) at the kernel boundary
    if b_pad != B:
        z = jnp.pad(z, ((0, b_pad - B), (0, 0)))

    # VMEM at tile_b=1024: ~0.9 MiB in + ~1.5 MiB out (double-buffered) — far
    # under the scoped default on every generation, so no vmem_limit override.
    y = pl.pallas_call(
        all_decoder_kernel,
        out_shape=jax.ShapeDtypeStruct((b_pad, out_dim), jnp.float32),
        grid=(n_tiles,),
        in_specs=[
            pl.BlockSpec((tile_b, Z), lambda i: (i, 0)),     # batch tile
            pl.BlockSpec((Z, out_dim), lambda i: (0, 0)),    # fused weight, resident
            pl.BlockSpec((1, out_dim), lambda i: (0, 0)),    # fused bias, resident
        ],
        # Full (unpadded) 180-wide last dim: one clean vreg + one masked vst,
        # no extra writeback and no wrapper column slice.
        out_specs=pl.BlockSpec((tile_b, out_dim), lambda i: (i, 0)),
        compiler_params=pltpu.CompilerParams(
            dimension_semantics=("parallel",)),  # shard batch tiles across TCs
    )(z, w_fused, b_fused)

    if b_pad != B:
        y = y[:B]
    return y.reshape(B, num_steps, wpt_dim)


def init_params(key, z_feat_dim, hidden_dim, num_steps, wpt_dim):
    # Deterministic init mimicking nn.Linear's uniform(-1/sqrt(fan_in), 1/sqrt(fan_in)).
    # Weights are stored transposed relative to PyTorch: math is y = x @ W + b.
    k1, k2, k3, k4 = jax.random.split(key, 4)
    out_dim = num_steps * wpt_dim
    lim1 = 1.0 / jnp.sqrt(jnp.float32(z_feat_dim))
    lim2 = 1.0 / jnp.sqrt(jnp.float32(hidden_dim))
    w1 = jax.random.uniform(k1, (z_feat_dim, hidden_dim), jnp.float32, -lim1, lim1)
    b1 = jax.random.uniform(k2, (1, hidden_dim), jnp.float32, -lim1, lim1)
    w2 = jax.random.uniform(k3, (hidden_dim, out_dim), jnp.float32, -lim2, lim2)
    b2 = jax.random.uniform(k4, (1, out_dim), jnp.float32, -lim2, lim2)
    return w1, b1, w2, b2


if __name__ == "__main__":
    z_feat_dim, hidden_dim, num_steps, wpt_dim = 32, 64, 30, 6
    batch = 4

    key = jax.random.PRNGKey(0)
    kz, kp = jax.random.split(key)
    z_all = jax.random.normal(kz, (batch, z_feat_dim), jnp.float32)
    w1, b1, w2, b2 = init_params(kp, z_feat_dim, hidden_dim, num_steps, wpt_dim)

    # Reference: the exact (unfused) math of the PyTorch forward, in f32.
    ref = ((z_all @ w1 + b1) @ w2 + b2).reshape(batch, num_steps, wpt_dim)

    # --- strict-fidelity f32 path -----------------------------------------
    wf32, bf32 = prepare_fused_params(w1, b1, w2, b2, param_dtype=jnp.float32)
    out_f32 = all_decoder_forward(z_all, wf32, bf32,
                                  num_steps=num_steps, wpt_dim=wpt_dim)
    out_f32 = jax.block_until_ready(out_f32)
    assert out_f32.shape == (batch, num_steps, wpt_dim)
    assert jnp.allclose(out_f32, ref, atol=1e-4, rtol=1e-4), float(
        jnp.max(jnp.abs(out_f32 - ref)))

    # --- default bf16 fast path (halves input/weight HBM traffic) ----------
    wbf, bbf = prepare_fused_params(w1, b1, w2, b2)   # bf16 weights, f32 bias
    out_bf = all_decoder_forward(z_all, wbf, bbf,
                                 num_steps=num_steps, wpt_dim=wpt_dim)
    out_bf = jax.block_until_ready(out_bf)
    assert out_bf.shape == (batch, num_steps, wpt_dim)
    assert jnp.allclose(out_bf, ref, atol=3e-2, rtol=3e-2), float(
        jnp.max(jnp.abs(out_bf - ref)))

    print("KERNEL_OK")
</pallas_src>

<mosaic_0001>
module attributes {stable_mosaic.version = 11 : i64} {
  func.func @all_decoder_kernel(%arg0: i32, %arg1: memref<8x32xf32, #tpu.memory_space<vmem>>, %arg2: memref<32x180xf32, #tpu.memory_space<vmem>>, %arg3: memref<1x180xf32, #tpu.memory_space<vmem>>, %arg4: memref<8x180xf32, #tpu.memory_space<vmem>>) attributes {dimension_semantics = [#tpu.dimension_semantics<parallel>], iteration_bounds = array<i64: 1>, scalar_prefetch = 0 : i64, scratch_operands = 0 : i64, tpu.core_type = #tpu.core_type<tc>, window_params = [{transform_indices = @transform_0, window_bounds = array<i64: 8, 32>}, {pipeline_mode = #tpu.pipeline_mode<synchronous>, transform_indices = @transform_1, window_bounds = array<i64: 32, 180>}, {pipeline_mode = #tpu.pipeline_mode<synchronous>, transform_indices = @transform_2, window_bounds = array<i64: 1, 180>}, {transform_indices = @transform_3, window_bounds = array<i64: 8, 180>}]} {
    %c0 = arith.constant 0 : index
    %c0_0 = arith.constant 0 : index
    %0 = vector.load %arg1[%c0, %c0_0] : memref<8x32xf32, #tpu.memory_space<vmem>>, vector<8x32xf32>
    %c0_1 = arith.constant 0 : index
    %c0_2 = arith.constant 0 : index
    %1 = vector.load %arg2[%c0_1, %c0_2] : memref<32x180xf32, #tpu.memory_space<vmem>>, vector<32x180xf32>
    %cst = arith.constant dense<0.000000e+00> : vector<8x180xf32>
    %2 = tpu.matmul %0, %1, %cst {dimension_numbers = #tpu.dot_dimension_numbers<[1], [0], [0], [1], [0, 0, 1, 1], [], []>} : vector<8x32xf32>, vector<32x180xf32>, vector<8x180xf32> -> vector<8x180xf32>
    %c0_3 = arith.constant 0 : index
    %c0_4 = arith.constant 0 : index
    %3 = vector.load %arg3[%c0_3, %c0_4] : memref<1x180xf32, #tpu.memory_space<vmem>>, vector<1x180xf32>
    %4 = vector.broadcast %3 : vector<1x180xf32> to vector<8x180xf32>
    %5 = arith.addf %2, %4 : vector<8x180xf32>
    %c0_5 = arith.constant 0 : index
    %c0_6 = arith.constant 0 : index
    %6 = vector.load %arg4[%c0_5, %c0_6] : memref<8x180xf32, #tpu.memory_space<vmem>>, vector<8x180xf32>
    tpu.vector_store %arg4[%c0_5, %c0_6], %5 {strides = array<i32>} : memref<8x180xf32, #tpu.memory_space<vmem>>, vector<8x180xf32>,
    return
  }
  func.func @transform_0(%arg0: i32) -> (i32, i32) {
    %c0_i32 = arith.constant 0 : i32
    %c0_i32_0 = arith.constant 0 : i32
    return %arg0, %c0_i32 : i32, i32
  }
  func.func @transform_1(%arg0: i32) -> (i32, i32) {
    %c0_i32 = arith.constant 0 : i32
    %c0_i32_0 = arith.constant 0 : i32
    %c0_i32_1 = arith.constant 0 : i32
    return %c0_i32, %c0_i32_0 : i32, i32
  }
  func.func @transform_2(%arg0: i32) -> (i32, i32) {
    %c0_i32 = arith.constant 0 : i32
    %c0_i32_0 = arith.constant 0 : i32
    %c0_i32_1 = arith.constant 0 : i32
    return %c0_i32, %c0_i32_0 : i32, i32
  }
  func.func @transform_3(%arg0: i32) -> (i32, i32) {
    %c0_i32 = arith.constant 0 : i32
    %c0_i32_0 = arith.constant 0 : i32
    return %arg0, %c0_i32 : i32, i32
  }
}

</mosaic_0001>

<bundles_post_ra>
// kernel: all_decoder_forward.1
= control target key start
LH: loop header
LB: loop body
LE: loop exit
PB: predicated region body
PF: predicated region fallthrough
CT: control target
= control target key end

     0   :  { %8 = vsyncpa [#allocation3], 0  ;;  %s169_s12 = smov [#allocation2]   ;;  %s217_s0 = inlined_call_operand.vmem [shape: f32[8,32], index: 0, kind: input, shape index: {}]   ;;  %s218_s1 = inlined_call_operand.hbm [shape: f32[32,180], index: 1, kind: input, shape index: {}]   ;;  %s219_s2 = inlined_call_operand.vmem [shape: f32[1,180], index: 2, kind: input, shape index: {}]   ;;  %s220_s3 = inlined_call_operand.vmem [shape: f32[8,180], index: 3, kind: output, shape index: {}]  }
   0x1   :  { %s16_s13 = sshll.u32 %s169_s12, 4  ;;  %s145_s16 = scalar_lea.hbm %s218_s1, 1024  ;;  %s17_s13 = int_to_ptr.vmem [resolvable:$true] %s16_s13 }
   0x2   :  { %p146_p0 = scmp.ne.s32.totalorder %s218_s1, %s145_s16  ;;  %p149_p1 = scmp.lt.u32.totalorder %s145_s16, %s218_s1 }
   0x4   :  { %p151_p2 = pnand %p149_p1, %p146_p0 }
   0x6   :  { %154 = shalt.err (!%p151_p2)
}
   0x7   :  { %s155_s21 = scalar_lea.vmem %s17_s13, 1024  ;;  %p160_p4 = scmp.lt.s32.totalorder %s17_s13, %s17_s13 }
   0x8   :  { %p156_p3 = scmp.ne.s32.totalorder %s17_s13, %s155_s21  ;;  %p161_p5 = scmp.lt.s32.totalorder %s155_s21, %s155_s21 }
   0xa   :  { %p162_p6 = por %p161_p5, %p160_p4 }
   0xc   :  { %p163_p7 = pnand %p162_p6, %p156_p3 }
   0xe   :  { %166 = shalt.err (!%p163_p7)
}
   0xf   :  { %s170_s22 = smov 256   ;;  %s171_s23 = smov 16  }
  0x10   :  { %22 = dma.hbm_to_vmem [thread:$0]  %s218_s1, 1024, %s17_s13, [#allocation3], %s170_s22, %s170_s22, %s171_s23  }
  0x11   :  { %167 = dma.done.wait [#allocation3], 1024  }
  0x12   :  { %168 = vsyncadd [#allocation3], 4294966272  ;;  %v172_v0 = vmov 0.0   ;;  %v30_v1 = vld [vmem:[#allocation2 + $0x8] sm:$0xff]  ;;  %v32_v2 = vld [vmem:[#allocation2 + $0x18] sm:$0xff]  ;;  %vm49_vm0 = vcmask 261120   ;;  %v39_v14 = vlaneseq }
  0x13   :  { %117 = vmatprep.mubr.f32.mxu0 %v172_v0  ;;  %v29_v3 = vld [vmem:[#allocation2] sm:$0xff]  ;;  %v133_v4 = vpack.c.bf16 %v32_v2, %v30_v1  ;;  %v31_v5 = vld [vmem:[#allocation2 + $0x10] sm:$0xff]  ;;  %v34_v6 = vld [vmem:[#allocation2 + $0x28] sm:$0xff]  ;;  %vm125_vm1 = vcmask 424960  }
  0x14   :  { %v36_v7 = vld [vmem:[#allocation2 + $0x38] sm:$0xff]  ;;  %v135_v8 = vpack.c.bf16 %v31_v5, %v29_v3  ;;  %v33_v10 = vld [vmem:[#allocation2 + $0x20] sm:$0xff]  ;;  %v35_v11 = vld [vmem:[#allocation2 + $0x30] sm:$0xff]  ;;  %v40_v15 = vshrl.u32 %v39_v14, 7 }
  0x15   :  { %v137_v9 = vpack.c.bf16 %v36_v7, %v34_v6  ;;  %134 = vmatprep.subr.bf16.mxu0 %v133_v4  ;;  %v139_v12 = vpack.c.bf16 %v35_v11, %v33_v10  ;;  %v28_v13 = vld [vmem:[%s217_s0] sm:$0xff] }
  0x16   :  { %136 = vmatpush1.bf16.msra.mxu0 %v135_v8  ;;  %v41_v16 = vsub.s32 0, %v40_v15  ;;  %v37_v17 = vld [vmem:[%s219_s2] sm:$0x3]  ;;  %v45_v18 = vsub.s32 1, %v40_v15 }
  0x17   :  { %138 = vmatprep.subr.bf16.mxu0 %v137_v9 }
  0x18   :  { %v42_v19 = vrot.slane %v37_v17, %v41_v16  ;;  %v46_v20 = vrot.slane %v37_v17, %v45_v18 }
  0x1a   :  { %140 = vmatpush1.bf16.msra.mxu0 %v139_v12 }
  0x1d   :  { %132 = vmatmul.mubr.msk.f32.vlgmr.msra.gmra.mrb[0].mxu0 %vm49_vm0, %v28_v13 }
  0xf0   :  { %v119_v21 = vpop.f32.mrb[0].mxu0 }
  0xf1   :  { %v120_v22 = vadd.f32 %v119_v21, %v42_v19  ;;  %v121_v23 = vpop.f32.mrb[1].mxu0 }
  0xf2   :  { %v122_v24 = vadd.f32 %v121_v23, %v46_v20 }
  0xf3   :  { %124 = vst [vmem:[%s220_s3] sm:$0xff] %v120_v22 }
  0xf4   :  { %126 = vst.msk [vmem:[%s220_s3 + $0x8] sm:$0xff] %vm125_vm1, %v122_v24 }
  0xf5   :  { %131 = vsyncpa [#allocation3], 1 }

</bundles_post_ra>
